<compile_context>
chip_gen: v7x
topology: tpu7x:2x2x1
jax: 0.10.0
libtpu: 0.0.40
codegen_flags: <defaults>
</compile_context>

<pallas_src>
import jax
import jax.numpy as jnp
from jax.experimental import pallas as pl
from jax.experimental.pallas import tpu as pltpu


def _identity_copy_kernel(x_ref, o_ref):
    # Pure element-wise identity copy of one lane-dense tile.
    o_ref[...] = x_ref[...]


def _choose_layout(n: int):
    """Pick a lane-dense (rows, cols) factorization of n (cols % 128 == 0)."""
    for cols in (1024, 512, 256, 128):
        if n % cols == 0:
            return n // cols, cols
    # Fallback for awkward sizes: single (1, n) block (still correct).
    return 1, n


def _choose_tile_rows(rows: int, cols: int, itemsize: int,
                      max_bytes: int = 2 * 1024 * 1024):
    """Largest row-tile that is a multiple of 8, divides rows, and keeps the
    block <= max_bytes (v7x-safe with double-buffered in+out). Falls back to
    the full row extent (full-dim blocks are always legal)."""
    if rows <= 8:
        return rows
    max_rows = max(1, max_bytes // max(1, cols * itemsize))
    best = None
    t = 8
    while t <= min(rows, max_rows):
        if rows % t == 0:
            best = t
        t += 8
    return best if best is not None else rows


@jax.jit
def identity2_forward(data: jax.Array) -> jax.Array:
    """Equivalent of Identity2.forward: data.view(1, -1)."""
    n = int(data.size)
    rows, cols = _choose_layout(n)
    tile_rows = _choose_tile_rows(rows, cols, data.dtype.itemsize)

    # Free metadata reshape: same row-major element order as torch .view(1,-1).
    flat2d = data.reshape(rows, cols)

    out2d = pl.pallas_call(
        _identity_copy_kernel,
        out_shape=jax.ShapeDtypeStruct((rows, cols), data.dtype),
        grid=(rows // tile_rows,),
        in_specs=[pl.BlockSpec((tile_rows, cols), lambda i: (i, 0))],
        out_specs=pl.BlockSpec((tile_rows, cols), lambda i: (i, 0)),
        input_output_aliases={0: 0},
        compiler_params=pltpu.CompilerParams(
            dimension_semantics=("parallel",)
        ),
    )(flat2d)

    # Free metadata reshape back to the torch .view(1, -1) shape.
    return out2d.reshape(1, n)


if __name__ == "__main__":
    key = jax.random.PRNGKey(0)
    # Small NCHW input consistent with a generic image-like tensor.
    x = jax.random.normal(key, (2, 4, 16, 16), dtype=jnp.float32)

    # Reference (semantics of torch .view(1, -1)); computed before the kernel
    # since the kernel is allowed to alias/donate its (intermediate) input.
    ref = x.reshape(1, -1)

    y = identity2_forward(x)
    y = jax.block_until_ready(y)

    assert y.shape == (1, 2 * 4 * 16 * 16), y.shape
    assert y.dtype == x.dtype
    assert bool(jnp.array_equal(y, ref))

    print("KERNEL_OK")
</pallas_src>

<mosaic_0001>
module attributes {stable_mosaic.version = 11 : i64} {
  func.func @_identity_copy_kernel(%arg0: i32, %arg1: memref<2x1024xf32, #tpu.memory_space<vmem>>, %arg2: memref<2x1024xf32, #tpu.memory_space<vmem>>) attributes {dimension_semantics = [#tpu.dimension_semantics<parallel>], iteration_bounds = array<i64: 1>, scalar_prefetch = 0 : i64, scratch_operands = 0 : i64, tpu.core_type = #tpu.core_type<tc>, window_params = [{transform_indices = @transform_0, window_bounds = array<i64: 2, 1024>}, {transform_indices = @transform_1, window_bounds = array<i64: 2, 1024>}]} {
    %c0 = arith.constant 0 : index
    %c0_0 = arith.constant 0 : index
    %0 = vector.load %arg1[%c0, %c0_0] : memref<2x1024xf32, #tpu.memory_space<vmem>>, vector<2x1024xf32>
    %c0_1 = arith.constant 0 : index
    %c0_2 = arith.constant 0 : index
    %1 = vector.load %arg2[%c0_1, %c0_2] : memref<2x1024xf32, #tpu.memory_space<vmem>>, vector<2x1024xf32>
    tpu.vector_store %arg2[%c0_1, %c0_2], %0 {strides = array<i32>} : memref<2x1024xf32, #tpu.memory_space<vmem>>, vector<2x1024xf32>,
    return
  }
  func.func @transform_0(%arg0: i32) -> (i32, i32) {
    %c0_i32 = arith.constant 0 : i32
    %c0_i32_0 = arith.constant 0 : i32
    return %arg0, %c0_i32 : i32, i32
  }
  func.func @transform_1(%arg0: i32) -> (i32, i32) {
    %c0_i32 = arith.constant 0 : i32
    %c0_i32_0 = arith.constant 0 : i32
    return %arg0, %c0_i32 : i32, i32
  }
}

</mosaic_0001>

<bundles_post_ra>
// kernel: identity2_forward.1
= control target key start
LH: loop header
LB: loop body
LE: loop exit
PB: predicated region body
PF: predicated region fallthrough
CT: control target
= control target key end

     0   :  { %s38_s0 = inlined_call_operand.vmem [shape: f32[2,1024], index: 0, kind: input, shape index: {}, may-alias: {0,1}]   ;;  %s39_s1 = inlined_call_operand.vmem [shape: f32[2,1024], index: 1, kind: output, shape index: {}, may-alias: {0,1}]  }
   0x1   :  { %v8_v0 = vld [vmem:[%s38_s0] sm:$0xff]  ;;  %v9_v1 = vld [vmem:[%s38_s0 + $0x8] sm:$0xff] }
   0x2   :  { %10 = vst [vmem:[%s39_s1] sm:$0xff] %v8_v0  ;;  %11 = vst [vmem:[%s39_s1 + $0x8] sm:$0xff] %v9_v1 }

</bundles_post_ra>
